<compile_context>
chip_gen: v5e
topology: v5e:2x2
jax: 0.10.0
libtpu: 0.0.40
codegen_flags: <defaults>
</compile_context>

<pallas_src>
import jax
import jax.numpy as jnp
from jax.experimental import pallas as pl
from jax.experimental.pallas import tpu as pltpu

N_IN = 625          # 25 * 25 flattened features (unpadded contraction dim)
N_HID = 256
N_OUT_PAD = 128     # lane-dense padded output width (n_classes <= 128)
EPS = 1e-5
SMALL_BATCH = 8     # below this: single un-pipelined VMEM-resident block
TB_MAX = 1024       # max batch tile (VMEM ~13 MiB double-buffered at 1024)


def fcn_kernel(x_ref, w1_ref, b1_ref, w2_ref, b2_ref, o_ref):
    # x: (tb, 625) f32 | w1: (625, 256) bf16 | b1: (1, 256) f32
    # w2: (256, 128) bf16 | b2: (1, 128) f32 | o: (tb, 128) f32
    xb = x_ref[...].astype(jnp.bfloat16)                  # cast in-kernel (no HBM copy)
    h = jnp.dot(xb, w1_ref[...], preferred_element_type=jnp.float32)
    h = jnp.maximum(h + b1_ref[...], 0.0)                 # bias + ReLU in f32 (exact)
    out = jnp.dot(h.astype(jnp.bfloat16), w2_ref[...],
                  preferred_element_type=jnp.float32)
    o_ref[...] = (out + b2_ref[...]).astype(o_ref.dtype)


def prepare_params(params):
    """One-time parameter prep: fold BN into Linear, transpose, pad, cast.

    Exact algebra (eval-mode BN, dropout = identity):
      h   = (x*s1 + t1) @ W1^T + b1 = x @ (diag(s1) W1^T) + (t1 @ W1^T + b1)
      out = (relu(h)*s2 + t2) @ W2^T + b2
          = relu(h) @ (diag(s2) W2^T) + (t2 @ W2^T + b2)
    """
    def fold(gamma, beta, mean, var):
        s = gamma / jnp.sqrt(var + EPS)
        return s, beta - mean * s

    s1, t1 = fold(params["bn1_gamma"], params["bn1_beta"],
                  params["bn1_mean"], params["bn1_var"])
    s2, t2 = fold(params["bn2_gamma"], params["bn2_beta"],
                  params["bn2_mean"], params["bn2_var"])

    w1 = params["l_weight"].T.astype(jnp.float32)    # (625, 256)
    b1 = params["l_bias"].astype(jnp.float32)        # (256,)
    w2 = params["o_weight"].T.astype(jnp.float32)    # (256, n_classes)
    b2 = params["o_bias"].astype(jnp.float32)        # (n_classes,)
    n_classes = w2.shape[1]
    assert n_classes <= N_OUT_PAD, (
        f"n_classes={n_classes} exceeds padded output width {N_OUT_PAD}")

    w1f = s1[:, None] * w1                # (625, 256), K left unpadded
    b1f = t1 @ w1 + b1                    # (256,)
    w2f = s2[:, None] * w2                # (256, n_classes)
    b2f = t2 @ w2 + b2                    # (n_classes,)

    # Zero-pad the tiny output head to 128 lanes (lane-dense, unmasked vst).
    w2p = jnp.zeros((N_HID, N_OUT_PAD), jnp.float32).at[:, :n_classes].set(w2f)
    b2p = jnp.zeros((N_OUT_PAD,), jnp.float32).at[:n_classes].set(b2f)

    prep = {
        "w1": w1f.astype(jnp.bfloat16),       # (625, 256) bf16
        "b1": b1f.reshape(1, N_HID),          # f32
        "w2": w2p.astype(jnp.bfloat16),       # (256, 128) bf16
        "b2": b2p.reshape(1, N_OUT_PAD),      # f32
    }
    return prep, n_classes


def _pick_tb(batch):
    """Batch tile: multiple of 256 rows, >=2 grid steps when possible (keeps
    both v7x TensorCores busy via the "parallel" axis), capped at TB_MAX."""
    half = (batch + 1) // 2
    tb = ((half + 255) // 256) * 256
    return max(256, min(tb, TB_MAX))


def base_fcn_bnr_forward(x_nchw, prep, n_classes):
    """x_nchw: (B, C, H, W) with C*H*W == 625. Returns (B, n_classes) f32."""
    B = x_nchw.shape[0]
    x = x_nchw.reshape(B, -1)                    # Flatten (row-major == torch), no copy
    assert x.shape[1] == N_IN
    x = x.astype(jnp.float32)                    # no-op if already f32

    w1, b1, w2, b2 = prep["w1"], prep["b1"], prep["w2"], prep["b2"]

    if B <= SMALL_BATCH:
        # Tiny batch: pure latency regime -> one un-pipelined VMEM-resident block.
        vmem = pl.BlockSpec(memory_space=pltpu.MemorySpace.VMEM)
        out = pl.pallas_call(
            fcn_kernel,
            out_shape=jax.ShapeDtypeStruct((B, N_OUT_PAD), jnp.float32),
            in_specs=[vmem, vmem, vmem, vmem, vmem],
            out_specs=vmem,
        )(x, w1, b1, w2, b2)
    else:
        # Batch-tiled pipeline: x/out stream per tile (ragged last block OK),
        # weights pinned at block (0,0) so they stay VMEM-resident.
        tb = _pick_tb(B)
        out = pl.pallas_call(
            fcn_kernel,
            out_shape=jax.ShapeDtypeStruct((B, N_OUT_PAD), jnp.float32),
            grid=(pl.cdiv(B, tb),),
            in_specs=[
                pl.BlockSpec((tb, N_IN), lambda i: (i, 0)),         # x stream
                pl.BlockSpec((N_IN, N_HID), lambda i: (0, 0)),      # w1 pinned
                pl.BlockSpec((1, N_HID), lambda i: (0, 0)),         # b1 pinned
                pl.BlockSpec((N_HID, N_OUT_PAD), lambda i: (0, 0)), # w2 pinned
                pl.BlockSpec((1, N_OUT_PAD), lambda i: (0, 0)),     # b2 pinned
            ],
            out_specs=pl.BlockSpec((tb, N_OUT_PAD), lambda i: (i, 0)),
            compiler_params=pltpu.CompilerParams(
                dimension_semantics=("parallel",),
                vmem_limit_bytes=32 * 1024 * 1024),
        )(x, w1, b1, w2, b2)

    # bf16 matmul operands (f32 accumulation) -> logits carry ~1e-2-level error.
    return out[:, :n_classes]


def _reference(x_nchw, params):
    """Pure-JAX f32 reference mirroring the eval-mode PyTorch forward."""
    B = x_nchw.shape[0]
    x = x_nchw.reshape(B, -1).astype(jnp.float32)
    x = (x - params["bn1_mean"]) / jnp.sqrt(params["bn1_var"] + EPS) \
        * params["bn1_gamma"] + params["bn1_beta"]
    x = x @ params["l_weight"].T + params["l_bias"]
    x = jnp.maximum(x, 0.0)
    x = (x - params["bn2_mean"]) / jnp.sqrt(params["bn2_var"] + EPS) \
        * params["bn2_gamma"] + params["bn2_beta"]
    return x @ params["o_weight"].T + params["o_bias"]


def make_params(key, n_classes):
    ks = jax.random.split(key, 10)
    f32 = jnp.float32
    return {
        # BatchNorm1d(625): gamma/beta + (nontrivial) running stats
        "bn1_gamma": 1.0 + 0.1 * jax.random.normal(ks[0], (N_IN,), f32),
        "bn1_beta": 0.1 * jax.random.normal(ks[1], (N_IN,), f32),
        "bn1_mean": 0.05 * jax.random.normal(ks[2], (N_IN,), f32),
        "bn1_var": 1.0 + 0.1 * jax.random.uniform(ks[3], (N_IN,), f32),
        # Linear(625, 256)
        "l_weight": 0.05 * jax.random.normal(ks[4], (N_HID, N_IN), f32),
        "l_bias": 0.05 * jax.random.normal(ks[5], (N_HID,), f32),
        # BatchNorm1d(256)
        "bn2_gamma": 1.0 + 0.1 * jax.random.normal(ks[6], (N_HID,), f32),
        "bn2_beta": 0.1 * jax.random.normal(ks[7], (N_HID,), f32),
        "bn2_mean": 0.05 * jax.random.normal(ks[8], (N_HID,), f32),
        "bn2_var": 1.0 + 0.1 * jax.random.uniform(ks[9], (N_HID,), f32),
        # Linear(256, n_classes)
        "o_weight": 0.05 * jax.random.normal(jax.random.fold_in(key, 100),
                                             (n_classes, N_HID), f32),
        "o_bias": 0.05 * jax.random.normal(jax.random.fold_in(key, 101),
                                           (n_classes,), f32),
    }


if __name__ == "__main__":
    key = jax.random.PRNGKey(0)
    n_cls = 10

    params = make_params(key, n_cls)
    prep, n_classes = prepare_params(params)        # one-time, off hot path

    # 1) Tiny batch -> single un-pipelined VMEM block path.
    x_small = jax.random.normal(jax.random.fold_in(key, 7), (2, 1, 25, 25),
                                jnp.float32)
    out_small = jax.block_until_ready(base_fcn_bnr_forward(x_small, prep, n_classes))
    ref_small = _reference(x_small, params)
    assert out_small.shape == (2, n_cls)
    assert jnp.allclose(out_small, ref_small, atol=5e-2, rtol=5e-2), (
        f"small-batch max err {jnp.max(jnp.abs(out_small - ref_small))}")

    # 2) Larger batch (not a multiple of the tile) -> pipelined grid path with
    #    a ragged last block, exercising the streaming/"parallel" code path.
    x_big = jax.random.normal(jax.random.fold_in(key, 8), (300, 1, 25, 25),
                              jnp.float32)
    out_big = jax.block_until_ready(base_fcn_bnr_forward(x_big, prep, n_classes))
    ref_big = _reference(x_big, params)
    assert out_big.shape == (300, n_cls)
    assert jnp.allclose(out_big, ref_big, atol=5e-2, rtol=5e-2), (
        f"pipelined max err {jnp.max(jnp.abs(out_big - ref_big))}")

    print("KERNEL_OK")
</pallas_src>

<mosaic_0001>
module attributes {stable_mosaic.version = 11 : i64} {
  func.func @fcn_kernel(%arg0: memref<2x625xf32, #tpu.memory_space<vmem>>, %arg1: memref<625x256xbf16, #tpu.memory_space<vmem>>, %arg2: memref<1x256xf32, #tpu.memory_space<vmem>>, %arg3: memref<256x128xbf16, #tpu.memory_space<vmem>>, %arg4: memref<1x128xf32, #tpu.memory_space<vmem>>, %arg5: memref<2x128xf32, #tpu.memory_space<vmem>>) attributes {dimension_semantics = [], scalar_prefetch = 0 : i64, scratch_operands = 0 : i64, tpu.core_type = #tpu.core_type<tc>} {
    %c0 = arith.constant 0 : index
    %c0_0 = arith.constant 0 : index
    %0 = vector.load %arg0[%c0, %c0_0] : memref<2x625xf32, #tpu.memory_space<vmem>>, vector<2x625xf32>
    %1 = arith.truncf %0 : vector<2x625xf32> to vector<2x625xbf16>
    %c0_1 = arith.constant 0 : index
    %c0_2 = arith.constant 0 : index
    %2 = vector.load %arg1[%c0_1, %c0_2] : memref<625x256xbf16, #tpu.memory_space<vmem>>, vector<625x256xbf16>
    %cst = arith.constant dense<0.000000e+00> : vector<2x256xf32>
    %3 = tpu.matmul %1, %2, %cst {dimension_numbers = #tpu.dot_dimension_numbers<[1], [0], [0], [1], [0, 0, 1, 1], [], []>} : vector<2x625xbf16>, vector<625x256xbf16>, vector<2x256xf32> -> vector<2x256xf32>
    %c0_3 = arith.constant 0 : index
    %c0_4 = arith.constant 0 : index
    %4 = vector.load %arg2[%c0_3, %c0_4] : memref<1x256xf32, #tpu.memory_space<vmem>>, vector<1x256xf32>
    %5 = vector.broadcast %4 : vector<1x256xf32> to vector<2x256xf32>
    %6 = arith.addf %3, %5 : vector<2x256xf32>
    %cst_5 = arith.constant 0.000000e+00 : f32
    %7 = vector.broadcast %cst_5 : f32 to vector<2x256xf32>
    %8 = arith.maximumf %6, %7 : vector<2x256xf32>
    %9 = arith.truncf %8 : vector<2x256xf32> to vector<2x256xbf16>
    %c0_6 = arith.constant 0 : index
    %c0_7 = arith.constant 0 : index
    %10 = vector.load %arg3[%c0_6, %c0_7] : memref<256x128xbf16, #tpu.memory_space<vmem>>, vector<256x128xbf16>
    %cst_8 = arith.constant dense<0.000000e+00> : vector<2x128xf32>
    %11 = tpu.matmul %9, %10, %cst_8 {dimension_numbers = #tpu.dot_dimension_numbers<[1], [0], [0], [1], [0, 0, 1, 1], [], []>} : vector<2x256xbf16>, vector<256x128xbf16>, vector<2x128xf32> -> vector<2x128xf32>
    %c0_9 = arith.constant 0 : index
    %c0_10 = arith.constant 0 : index
    %12 = vector.load %arg4[%c0_9, %c0_10] : memref<1x128xf32, #tpu.memory_space<vmem>>, vector<1x128xf32>
    %13 = vector.broadcast %12 : vector<1x128xf32> to vector<2x128xf32>
    %14 = arith.addf %11, %13 : vector<2x128xf32>
    %c0_11 = arith.constant 0 : index
    %c0_12 = arith.constant 0 : index
    %15 = vector.load %arg5[%c0_11, %c0_12] : memref<2x128xf32, #tpu.memory_space<vmem>>, vector<2x128xf32>
    tpu.vector_store %arg5[%c0_11, %c0_12], %14 {strides = array<i32>} : memref<2x128xf32, #tpu.memory_space<vmem>>, vector<2x128xf32>,
    return
  }
}

</mosaic_0001>

<bundles_post_ra>
// kernel: tpu_custom_call.1
= control target key start
LH: loop header
LB: loop body
LE: loop exit
PB: predicated region body
PF: predicated region fallthrough
CT: control target
= control target key end

     0   :  { %10 = vsyncpa [#allocation3], 0  ;;  %s1607_s0 = inlined_call_operand.hbm [shape: f32[2,625], index: 0, kind: input, shape index: {}]   ;;  %s1608_s1 = inlined_call_operand.hbm [shape: bf16[625,256], index: 1, kind: input, shape index: {}]   ;;  %s1609_s2 = inlined_call_operand.hbm [shape: f32[1,256], index: 2, kind: input, shape index: {}]   ;;  %s1610_s3 = inlined_call_operand.hbm [shape: bf16[256,128], index: 3, kind: input, shape index: {}]   ;;  %s1611_s4 = inlined_call_operand.vmem [shape: f32[1,128], index: 4, kind: input, shape index: {}]   ;;  %s1612_s5 = inlined_call_operand.hbm [shape: f32[2,128], index: 5, kind: output, shape index: {}]  }
   0x1   :  { %11 = vsyncpa [#allocation6], 0 }
   0x2   :  { %12 = vsyncpa [#allocation9], 0  ;;  %s29_s20 = sshll.u32 %s1608_s1, 4  ;;  %s30_s20 = int_to_ptr.hbm [resolvable:$true] %s29_s20 }
   0x3   :  { %13 = vsyncpa [#allocation4], 0  ;;  %s1518_s21 = smov [#allocation5]   ;;  %s19_s25 = sshll.u32 %s1607_s0, 4  ;;  %s20_s25 = int_to_ptr.hbm [resolvable:$true] %s19_s25 }
   0x4   :  { %s31_s22 = sshll.u32 %s1518_s21, 4  ;;  %s1519_s26 = smov 128   ;;  %s32_s22 = int_to_ptr.vmem [resolvable:$true] %s31_s22 }
   0x5   :  { %s1520_s27 = smov 8   ;;  %s1521_s28 = smov [#allocation2]  }
   0x6   :  { %37 = dma.hbm_to_vmem [thread:$0]  %s30_s20, 10112, %s32_s22, [#allocation6], %s1519_s26, %s1519_s26, %s1520_s27  }
   0x7   :  { %s21_s29 = sshll.u32 %s1521_s28, 4  ;;  %s43_s7 = sshll.u32 %s1609_s2, 4  ;;  %s22_s29 = int_to_ptr.vmem [resolvable:$true] %s21_s29  ;;  %s44_s7 = int_to_ptr.hbm [resolvable:$true] %s43_s7 }
   0x8   :  { %24 = dma.hbm_to_vmem [thread:$0]  %s20_s25, 160, %s22_s29, [#allocation3]  }
   0x9   :  { %s53_s9 = sshll.u32 %s1610_s3, 4  ;;  %s1522_s10 = smov [#allocation7]   ;;  %s54_s9 = int_to_ptr.hbm [resolvable:$true] %s53_s9 }
   0xa   :  { %s45_s11 = sshll.u32 %s1522_s10, 4  ;;  %s1523_s0 = smov [#allocation8]   ;;  %s46_s11 = int_to_ptr.vmem [resolvable:$true] %s45_s11 }
   0xb   :  { %48 = dma.hbm_to_vmem [thread:$0]  %s44_s7, 32, %s46_s11, [#allocation6]  }
   0xc   :  { %s55_s12 = sshll.u32 %s1523_s0, 4  ;;  %s1524_s13 = smov 64   ;;  %s56_s12 = int_to_ptr.vmem [resolvable:$true] %s55_s12 }
   0xd   :  { %s1525_s14 = smov 4  }
   0xe   :  { %61 = dma.hbm_to_vmem [thread:$0]  %s54_s9, 2048, %s56_s12, [#allocation9], %s1524_s13, %s1524_s13, %s1525_s14  }
   0xf   :  { %1510 = dma.done.wait [#allocation3], 160  }
  0x10   :  { %1511 = vsyncadd [#allocation3], 4294967136 }
  0x11   :  { %1512 = dma.done.wait [#allocation6], 10144  }
  0x12   :  { %1513 = vsyncadd [#allocation6], 4294957152 }
  0x13   :  { %1514 = dma.done.wait [#allocation9], 2048  }
  0x14   :  { %1515 = vsyncadd [#allocation9], 4294965248  ;;  %v965_v0 = vld [vmem:[#allocation5 + $0x70] sm:$0xf]  ;;  %v1300_v1 = vld [vmem:[#allocation5 + $0x74] sm:$0xf0] }
  0x15   :  { %v1029_v2 = vld [vmem:[#allocation5 + $0xf0] sm:$0xf]  ;;  %v966_v3 = vor.u32 %v1300_v1, %v965_v0  ;;  %v1316_v4 = vld [vmem:[#allocation5 + $0xf4] sm:$0xf0]  ;;  %v957_v5 = vld [vmem:[#allocation5 + $0x60] sm:$0xf] }
  0x16   :  { %v1298_v6 = vld [vmem:[#allocation5 + $0x64] sm:$0xf0]  ;;  %v1030_v7 = vor.u32 %v1316_v4, %v1029_v2  ;;  %v1021_v8 = vld [vmem:[#allocation5 + $0xe0] sm:$0xf]  ;;  %v949_v11 = vld [vmem:[#allocation5 + $0x50] sm:$0xf] }
  0x17   :  { %v1314_v9 = vld [vmem:[#allocation5 + $0xe4] sm:$0xf0]  ;;  %595 = vmatpush.bf16.msra.mxu0 %v966_v3  ;;  %v958_v10 = vor.u32 %v1298_v6, %v957_v5  ;;  %v1296_v13 = vld [vmem:[#allocation5 + $0x54] sm:$0xf0]  ;;  %v1093_v14 = vld [vmem:[#allocation5 + $0x170] sm:$0xf] }
  0x18   :  { %608 = vmatpush.bf16.msra.mxu1 %v1030_v7  ;;  %v1022_v12 = vor.u32 %v1314_v9, %v1021_v8  ;;  %v1332_v15 = vld [vmem:[#allocation5 + $0x174] sm:$0xf0]  ;;  %v1013_v16 = vld [vmem:[#allocation5 + $0xd0] sm:$0xf]  ;;  %v1085_v21 = vld [vmem:[#allocation5 + $0x160] sm:$0xf]  ;;  %v950_v22 = vor.u32 %v1296_v13, %v949_v11 }
  0x19   :  { %v1312_v17 = vld [vmem:[#allocation5 + $0xd4] sm:$0xf0]  ;;  %v1094_v18 = vor.u32 %v1332_v15, %v1093_v14  ;;  %v1157_v19 = vld [vmem:[#allocation5 + $0x1f0] sm:$0xf]  ;;  %v941_v23 = vld [vmem:[#allocation5 + $0x40] sm:$0xf] }
  0x1a   :  { %v1348_v20 = vld [vmem:[#allocation5 + $0x1f4] sm:$0xf0]  ;;  %v1294_v24 = vld [vmem:[#allocation5 + $0x44] sm:$0xf0]  ;;  %v1014_v27 = vor.u32 %v1312_v17, %v1013_v16  ;;  %v1005_v28 = vld [vmem:[#allocation5 + $0xc0] sm:$0xf] }
  0x1b   :  { %596 = vmatpush.bf16.msra.mxu0 %v958_v10  ;;  %621 = vmatpush.bf16.msra.mxu2 %v1094_v18  ;;  %v1158_v25 = vor.u32 %v1348_v20, %v1157_v19  ;;  %v1330_v26 = vld [vmem:[#allocation5 + $0x164] sm:$0xf0]  ;;  %v1149_v31 = vld [vmem:[#allocation5 + $0x1e0] sm:$0xf]  ;;  %v1077_v33 = vld [vmem:[#allocation5 + $0x150] sm:$0xf]  ;;  %v942_v36 = vor.u32 %v1294_v24, %v941_v23 }
  0x1c   :  { %609 = vmatpush.bf16.msra.mxu1 %v1022_v12  ;;  %v1310_v29 = vld [vmem:[#allocation5 + $0xc4] sm:$0xf0]  ;;  %v1086_v30 = vor.u32 %v1330_v26, %v1085_v21  ;;  %v1328_v34 = vld [vmem:[#allocation5 + $0x154] sm:$0xf0]  ;;  %v933_v37 = vld [vmem:[#allocation5 + $0x30] sm:$0xf] }
  0x1d   :  { %634 = vmatpush.bf16.msra.mxu3 %v1158_v25  ;;  %v1346_v32 = vld [vmem:[#allocation5 + $0x1e4] sm:$0xf0]  ;;  %v1078_v38 = vor.u32 %v1328_v34, %v1077_v33  ;;  %v1141_v39 = vld [vmem:[#allocation5 + $0x1d0] sm:$0xf]  ;;  %v1344_v40 = vld [vmem:[#allocation5 + $0x1d4] sm:$0xf0]  ;;  %v1006_v41 = vor.u32 %v1310_v29, %v1005_v28 }
  0x1e   :  { %v1150_v35 = vor.u32 %v1346_v32, %v1149_v31  ;;  %v1292_v42 = vld [vmem:[#allocation5 + $0x34] sm:$0xf0]  ;;  %v1069_v43 = vld [vmem:[#allocation5 + $0x140] sm:$0xf]  ;;  %v1326_v44 = vld [vmem:[#allocation5 + $0x144] sm:$0xf0]  ;;  %v1142_v47 = vor.u32 %v1344_v40, %v1141_v39 }
  0x1f   :  { %597 = vmatpush.bf16.msra.mxu0 %v950_v22  ;;  %622 = vmatpush.bf16.msra.mxu2 %v1086_v30  ;;  %v997_v45 = vld [vmem:[#allocation5 + $0xb0] sm:$0xf]  ;;  %v1308_v46 = vld [vmem:[#allocation5 + $0xb4] sm:$0xf0]  ;;  %v1133_v48 = vld [vmem:[#allocation5 + $0x1c0] sm:$0xf]  ;;  %v934_v50 = vor.u32 %v1292_v42, %v933_v37  ;;  %v1070_v52 = vor.u32 %v1326_v44, %v1069_v43 }
  0x20   :  { %610 = vmatpush.bf16.msra.mxu1 %v1014_v27  ;;  %v1342_v49 = vld [vmem:[#allocation5 + $0x1c4] sm:$0xf0]  ;;  %v925_v51 = vld [vmem:[#allocation5 + $0x20] sm:$0xf]  ;;  %v998_v53 = vor.u32 %v1308_v46, %v997_v45  ;;  %v1061_v55 = vld [vmem:[#allocation5 + $0x130] sm:$0xf] }
  0x21   :  { %635 = vmatpush.bf16.msra.mxu3 %v1150_v35  ;;  %v1290_v54 = vld [vmem:[#allocation5 + $0x24] sm:$0xf0]  ;;  %v1324_v56 = vld [vmem:[#allocation5 + $0x134] sm:$0xf0]  ;;  %v989_v57 = vld [vmem:[#allocation5 + $0xa0] sm:$0xf]  ;;  %v1134_v59 = vor.u32 %v1342_v49, %v1133_v48 }
  0x22   :  { %v1306_v58 = vld [vmem:[#allocation5 + $0xa4] sm:$0xf0]  ;;  %v1570_v60 = vld [vmem:[#allocation5 + $0x270] sm:$0x11]  ;;  %v1340_v62 = vld [vmem:[#allocation5 + $0x1b4] sm:$0xf0]  ;;  %v926_v63 = vor.u32 %v1290_v54, %v925_v51  ;;  %v1062_v1 = vor.u32 %v1324_v56, %v1061_v55 }
  0x23   :  { %598 = vmatpush.bf16.msra.mxu0 %v942_v36  ;;  %623 = vmatpush.bf16.msra.mxu2 %v1078_v38  ;;  %v1125_v61 = vld [vmem:[#allocation5 + $0x1b0] sm:$0xf]  ;;  %vm586_vm0 = vcmask 1040384   ;;  %v990_v2 = vor.u32 %v1306_v58, %v989_v57  ;;  %v1288_v3 = vld [vmem:[#allocation5 + $0x14] sm:$0xf0]  ;;  %v422_v4 = vunpack.c.l.b16 %v1570_v60  ;;  %v1526_v14 = vmov 0  }
  0x24   :  { %611 = vmatpush.bf16.msra.mxu1 %v1006_v41  ;;  %v917_v0 = vld [vmem:[#allocation5 + $0x10] sm:$0xf]  ;;  %v1053_v5 = vld [vmem:[#allocation5 + $0x120] sm:$0xf]  ;;  %v1322_v6 = vld [vmem:[#allocation5 + $0x124] sm:$0xf0]  ;;  %v1126_v9 = vor.u32 %v1340_v62, %v1125_v61 }
  0x25   :  { %636 = vmatpush.bf16.msra.mxu3 %v1142_v47  ;;  %v981_v7 = vld [vmem:[#allocation5 + $0x90] sm:$0xf]  ;;  %v1304_v8 = vld [vmem:[#allocation5 + $0x94] sm:$0xf0]  ;;  %v1117_v10 = vld [vmem:[#allocation5 + $0x1a0] sm:$0xf]  ;;  %v918_v12 = vor.u32 %v1288_v3, %v917_v0  ;;  %v1054_v16 = vor.u32 %v1322_v6, %v1053_v5  ;;  %v502_v19 = vpack.c.b16 %v422_v4, %v422_v4 }
  0x26   :  { %v1338_v11 = vld [vmem:[#allocation5 + $0x1a4] sm:$0xf0]  ;;  %v909_v13 = vld [vmem:[#allocation5] sm:$0xf]  ;;  %v1574_v15 = vsel %vm586_vm0, 65535, %v1526_v14  ;;  %v982_v17 = vor.u32 %v1304_v8, %v981_v7  ;;  %v80_v33 = vld [vmem:[#allocation2] sm:$0xff] }
  0x27   :  { %599 = vmatpush.bf16.msra.mxu0 %v934_v50  ;;  %624 = vmatpush.bf16.msra.mxu2 %v1070_v52  ;;  %v1286_v18 = vld [vmem:[#allocation5 + $0x4] sm:$0xf0]  ;;  %v1045_v20 = vld [vmem:[#allocation5 + $0x110] sm:$0xf]  ;;  %v1320_v21 = vld [vmem:[#allocation5 + $0x114] sm:$0xf0]  ;;  %v1118_v25 = vor.u32 %v1338_v11, %v1117_v10  ;;  %v590_v35 = vand.u32 %v1574_v15, %v502_v19 }
  0x28   :  { %612 = vmatpush.bf16.msra.mxu1 %v998_v53  ;;  %v973_v22 = vld [vmem:[#allocation5 + $0x80] sm:$0xf]  ;;  %v1302_v23 = vld [vmem:[#allocation5 + $0x84] sm:$0xf0]  ;;  %v1299_v24 = vld [vmem:[#allocation5 + $0x74] sm:$0xf]  ;;  %v910_v29 = vor.u32 %v1286_v18, %v909_v13  ;;  %v1046_v32 = vor.u32 %v1320_v21, %v1045_v20 }
  0x29   :  { %637 = vmatpush.bf16.msra.mxu3 %v1134_v59  ;;  %v967_v26 = vld [vmem:[#allocation5 + $0x78] sm:$0xf0]  ;;  %v1109_v27 = vld [vmem:[#allocation5 + $0x190] sm:$0xf]  ;;  %v1336_v28 = vld [vmem:[#allocation5 + $0x194] sm:$0xf0]  ;;  %v974_v34 = vor.u32 %v1302_v23, %v973_v22 }
  0x2a   :  { %v1213_v30 = vld [vmem:[#allocation5 + $0x260] sm:$0xf]  ;;  %v1362_v31 = vld [vmem:[#allocation5 + $0x264] sm:$0xf0]  ;;  %84 = vst [vmem:[#allocation1] ss:$4 sm:$0xff] %v80_v33  ;;  %v970_v38 = vor.u32 %v1299_v24, %v967_v26  ;;  %v1110_v40 = vor.u32 %v1336_v28, %v1109_v27 }
  0x2b   :  { %600 = vmatpush.bf16.msra.mxu0 %v926_v63  ;;  %625 = vmatpush.bf16.msra.mxu2 %v1062_v1  ;;  %v1037_v36 = vld [vmem:[#allocation5 + $0x100] sm:$0xf]  ;;  %v1318_v37 = vld [vmem:[#allocation5 + $0x104] sm:$0xf0]  ;;  %v1297_v39 = vld [vmem:[#allocation5 + $0x64] sm:$0xf]  ;;  %v1214_v49 = vor.u32 %v1362_v31, %v1213_v30 }
  0x2c   :  { %613 = vmatpush.bf16.msra.mxu1 %v990_v2  ;;  %v1315_v41 = vld [vmem:[#allocation5 + $0xf4] sm:$0xf]  ;;  %v1031_v42 = vld [vmem:[#allocation5 + $0xf8] sm:$0xf0]  ;;  %v959_v43 = vld [vmem:[#allocation5 + $0x68] sm:$0xf0]  ;;  %v1038_v46 = vor.u32 %v1318_v37, %v1037_v36 }
  0x2d   :  { %638 = vmatpush.bf16.msra.mxu3 %v1126_v9  ;;  %v1101_v44 = vld [vmem:[#allocation5 + $0x180] sm:$0xf]  ;;  %v1334_v45 = vld [vmem:[#allocation5 + $0x184] sm:$0xf0]  ;;  %v1331_v47 = vld [vmem:[#allocation5 + $0x174] sm:$0xf]  ;;  %v1034_v52 = vor.u32 %v1315_v41, %v1031_v42  ;;  %v962_v53 = vor.u32 %v1297_v39, %v959_v43 }
  0x2e   :  { %v1095_v48 = vld [vmem:[#allocation5 + $0x178] sm:$0xf0]  ;;  %v1205_v50 = vld [vmem:[#allocation5 + $0x250] sm:$0xf]  ;;  %v1360_v51 = vld [vmem:[#allocation5 + $0x254] sm:$0xf0]  ;;  %v1102_v55 = vor.u32 %v1334_v45, %v1101_v44 }
  0x2f   :  { %601 = vmatpush.bf16.msra.mxu0 %v918_v12  ;;  %626 = vmatpush.bf16.msra.mxu2 %v1054_v16  ;;  %v1295_v54 = vld [vmem:[#allocation5 + $0x54] sm:$0xf]  ;;  %v1313_v56 = vld [vmem:[#allocation5 + $0xe4] sm:$0xf]  ;;  %v1023_v57 = vld [vmem:[#allocation5 + $0xe8] sm:$0xf0]  ;;  %v1098_v59 = vor.u32 %v1331_v47, %v1095_v48  ;;  %v1206_v63 = vor.u32 %v1360_v51, %v1205_v50 }
  0x30   :  { %614 = vmatpush.bf16.msra.mxu1 %v982_v17  ;;  %v951_v58 = vld [vmem:[#allocation5 + $0x58] sm:$0xf0]  ;;  %v1329_v61 = vld [vmem:[#allocation5 + $0x164] sm:$0xf]  ;;  %v1087_v62 = vld [vmem:[#allocation5 + $0x168] sm:$0xf0]  ;;  %v1026_v4 = vor.u32 %v1313_v56, %v1023_v57 }
  0x31   :  { %639 = vmatpush.bf16.msra.mxu3 %v1118_v25  ;;  %v1197_v0 = vld [vmem:[#allocation5 + $0x240] sm:$0xf]  ;;  %v87_v1 = vld.sshfl [vmem:[#allocation1] sm:$0xff pattern:$0x73625140]  ;;  %v954_v8 = vor.u32 %v1295_v54, %v951_v58  ;;  %v1090_v17 = vor.u32 %v1329_v61, %v1087_v62  ;;  %vm582_vm1 = vcmask 924672  }
  0x32   :  { %v89_v2 = vld.sshfl [vmem:[#allocation1 + $0x10] sm:$0xff pattern:$0x73625140]  ;;  %v1577_v3 = vpack.c.bf16 %v87_v1, %v87_v1  ;;  %v88_v6 = vld.sshfl [vmem:[#allocation1 + $0x8] sm:$0xff pattern:$0x73625140] }
  0x33   :  { %602 = vmatpush.bf16.msra.mxu0 %v910_v29  ;;  %627 = vmatpush.bf16.msra.mxu2 %v1046_v32  ;;  %v1579_v5 = vpack.c.bf16 %v89_v2, %v89_v2  ;;  %v90_v7 = vld.sshfl [vmem:[#allocation1 + $0x18] sm:$0xff pattern:$0x73625140]  ;;  %v1311_v10 = vld [vmem:[#allocation5 + $0xd4] sm:$0xf]  ;;  %v1581_v12 = vpack.c.bf16 %v88_v6, %v88_v6  ;;  %s1527_s15 = smov [#allocation10]  }
  0x34   :  { %615 = vmatpush.bf16.msra.mxu1 %v974_v34  ;;  %v1358_v9 = vld [vmem:[#allocation5 + $0x244] sm:$0xf0]  ;;  %v1015_v11 = vld [vmem:[#allocation5 + $0xd8] sm:$0xf0]  ;;  %v1583_v13 = vpack.c.bf16 %v90_v7, %v90_v7  ;;  %v1293_v14 = vld [vmem:[#allocation5 + $0x44] sm:$0xf] }
  0x35   :  { %640 = vmatpush.bf16.msra.mxu3 %v1110_v40  ;;  %v943_v16 = vld [vmem:[#allocation5 + $0x48] sm:$0xf0]  ;;  %v1327_v18 = vld [vmem:[#allocation5 + $0x154] sm:$0xf]  ;;  %v1079_v19 = vld [vmem:[#allocation5 + $0x158] sm:$0xf0]  ;;  %v1198_v20 = vor.u32 %v1358_v9, %v1197_v0  ;;  %v1018_v23 = vor.u32 %v1311_v10, %v1015_v11 }
  0x36   :  { %603 = vmatmul.bf16.vlgmr.msra.gmra.mxu0 %v1577_v3  ;;  %v1189_v21 = vld [vmem:[#allocation5 + $0x230] sm:$0xf]  ;;  %v1356_v22 = vld [vmem:[#allocation5 + $0x234] sm:$0xf0]  ;;  %v946_v24 = vor.u32 %v1293_v14, %v943_v16  ;;  %v1309_v25 = vld [vmem:[#allocation5 + $0xc4] sm:$0xf]  ;;  %v1082_v30 = vor.u32 %v1327_v18, %v1079_v19 }
  0x37   :  { %647 = vmatpush.bf16.msrb.mxu0 %v590_v35  ;;  %628 = vmatpush.bf16.msra.mxu2 %v1038_v46  ;;  %v1007_v26 = vld [vmem:[#allocation5 + $0xc8] sm:$0xf0]  ;;  %v81_v27 = vld [vmem:[#allocation2 + $0x8] sm:$0x3]  ;;  %v1291_v28 = vld [vmem:[#allocation5 + $0x34] sm:$0xf]  ;;  %v1190_v33 = vor.u32 %v1356_v22, %v1189_v21 }
  0x38   :  { %660 = vmatpush.bf16.msrb.mxu1 %v970_v38  ;;  %v935_v29 = vld [vmem:[#allocation5 + $0x38] sm:$0xf0]  ;;  %86 = vst [vmem:[#allocation1 + $0x20] ss:$4 sm:$0xff] %v81_v27  ;;  %v1325_v31 = vld [vmem:[#allocation5 + $0x144] sm:$0xf]  ;;  %v1010_v35 = vor.u32 %v1309_v25, %v1007_v26 }
  0x39   :  { %641 = vmatpush.bf16.msra.mxu3 %v1102_v55  ;;  %616 = vmatmul.bf16.vlgmr.msra.gmra.mxu1 %v1581_v12  ;;  %v1071_v32 = vld [vmem:[#allocation5 + $0x148] sm:$0xf0]  ;;  %v1181_v34 = vld [vmem:[#allocation5 + $0x220] sm:$0xf]  ;;  %v938_v36 = vor.u32 %v1291_v28, %v935_v29  ;;  %v1354_v37 = vld [vmem:[#allocation5 + $0x224] sm:$0xf0] }
  0x3a   :  { %629 = vmatmul.bf16.vlgmr.msra.gmra.mxu2 %v1579_v5  ;;  %v1307_v38 = vld [vmem:[#allocation5 + $0xb4] sm:$0xf]  ;;  %v999_v39 = vld [vmem:[#allocation5 + $0xb8] sm:$0xf0]  ;;  %v1289_v40 = vld [vmem:[#allocation5 + $0x24] sm:$0xf]  ;;  %v1074_v42 = vor.u32 %v1325_v31, %v1071_v32  ;;  %v1182_v45 = vor.u32 %v1354_v37, %v1181_v34 }
  0x3b   :  { %648 = vmatpush.bf16.msrb.mxu0 %v1214_v49  ;;  %673 = vmatpush.bf16.msrb.mxu2 %v1034_v52  ;;  %v927_v41 = vld [vmem:[#allocation5 + $0x28] sm:$0xf0]  ;;  %v1323_v43 = vld [vmem:[#allocation5 + $0x134] sm:$0xf]  ;;  %v1063_v44 = vld [vmem:[#allocation5 + $0x138] sm:$0xf0]  ;;  %v1002_v47 = vor.u32 %v1307_v38, %v999_v39  ;;  %v423_v52 = vunpack.c.h.b16 %v1570_v60 }
  0x3c   :  { %661 = vmatpush.bf16.msrb.mxu1 %v962_v53  ;;  %642 = vmatmul.bf16.vlgmr.msra.gmra.mxu3 %v1583_v13  ;;  %v1173_v46 = vld [vmem:[#allocation5 + $0x210] sm:$0xf]  ;;  %v930_v48 = vor.u32 %v1289_v40, %v927_v41  ;;  %v1352_v49 = vld [vmem:[#allocation5 + $0x214] sm:$0xf0]  ;;  %v1305_v50 = vld [vmem:[#allocation5 + $0xa4] sm:$0xf]  ;;  %v1066_v55 = vor.u32 %v1323_v43, %v1063_v44 }
  0x3d   :  { %686 = vmatpush.bf16.msrb.mxu3 %v1098_v59  ;;  %v991_v51 = vld [vmem:[#allocation5 + $0xa8] sm:$0xf0]  ;;  %v1287_v53 = vld [vmem:[#allocation5 + $0x14] sm:$0xf]  ;;  %v919_v54 = vld [vmem:[#allocation5 + $0x18] sm:$0xf0]  ;;  %v1174_v58 = vor.u32 %v1352_v49, %v1173_v46 }
  0x3e   :  { %v1321_v56 = vld [vmem:[#allocation5 + $0x124] sm:$0xf]  ;;  %v1055_v57 = vld [vmem:[#allocation5 + $0x128] sm:$0xf0]  ;;  %v1165_v59 = vld [vmem:[#allocation5 + $0x200] sm:$0xf]  ;;  %v994_v62 = vor.u32 %v1305_v50, %v991_v51 }
  0x3f   :  { %649 = vmatpush.bf16.msrb.mxu0 %v1206_v63  ;;  %674 = vmatpush.bf16.msrb.mxu2 %v1026_v4  ;;  %v1350_v61 = vld [vmem:[#allocation5 + $0x204] sm:$0xf0]  ;;  %v922_v63 = vor.u32 %v1287_v53, %v919_v54  ;;  %v1285_v0 = vld [vmem:[#allocation5 + $0x4] sm:$0xf]  ;;  %v1303_v1 = vld [vmem:[#allocation5 + $0x94] sm:$0xf]  ;;  %v503_v4 = vpack.c.b16 %v423_v52, %v423_v52 }
  0x40   :  { %662 = vmatpush.bf16.msrb.mxu1 %v954_v8  ;;  %v983_v2 = vld [vmem:[#allocation5 + $0x98] sm:$0xf0]  ;;  %v911_v6 = vld [vmem:[#allocation5 + $0x8] sm:$0xf0]  ;;  %v1347_v60 = vld [vmem:[#allocation5 + $0x1f4] sm:$0xf]  ;;  %v1058_v8 = vor.u32 %v1321_v56, %v1055_v57  ;;  %v1166_v11 = vor.u32 %v1350_v61, %v1165_v59 }
  0x41   :  { %687 = vmatpush.bf16.msrb.mxu3 %v1090_v17  ;;  %v1159_v7 = vld [vmem:[#allocation5 + $0x1f8] sm:$0xf0]  ;;  %v1319_v9 = vld [vmem:[#allocation5 + $0x114] sm:$0xf]  ;;  %v986_v16 = vor.u32 %v1303_v1, %v983_v2  ;;  %v914_v17 = vor.u32 %v1285_v0, %v911_v6  ;;  %v1301_v19 = vld [vmem:[#allocation5 + $0x84] sm:$0xf]  ;;  %v593_v21 = vand.u32 %v1574_v15, %v503_v4 }
  0x42   :  { %v1047_v10 = vld [vmem:[#allocation5 + $0x118] sm:$0xf0]  ;;  %v91_v14 = vld.sshfl [vmem:[#allocation1 + $0x20] sm:$0xff pattern:$0x73625140]  ;;  %v1162_v18 = vor.u32 %v1347_v60, %v1159_v7  ;;  %v1368_v60 = vld [vmem:[#allocation8 + $0x28] sm:$0xff] }
  0x43   :  { %650 = vmatpush.bf16.msrb.mxu0 %v1198_v20  ;;  %675 = vmatpush.bf16.msrb.mxu2 %v1018_v23  ;;  %v975_v20 = vld [vmem:[#allocation5 + $0x88] sm:$0xf0]  ;;  %v1345_v22 = vld [vmem:[#allocation5 + $0x1e4] sm:$0xf]  ;;  %v1050_v25 = vor.u32 %v1319_v9, %v1047_v10  ;;  %v1591_v26 = vpack.c.bf16 %v91_v14, %v91_v14  ;;  %v1370_v32 = vld [vmem:[#allocation8 + $0x38] sm:$0xff]  ;;  %s893_s16 = sshll.u32 %s1527_s15, 4  ;;  %s894_s16 = int_to_ptr.vmem [resolvable:$true] %s893_s16 }
  0x44   :  { %663 = vmatpush.bf16.msrb.mxu1 %v946_v24  ;;  %v1151_v23 = vld [vmem:[#allocation5 + $0x1e8] sm:$0xf0]  ;;  %v1361_v24 = vld [vmem:[#allocation5 + $0x264] sm:$0xf]  ;;  %v1143_v34 = vld [vmem:[#allocation5 + $0x1d8] sm:$0xf0] }
  0x45   :  { %688 = vmatpush.bf16.msrb.mxu3 %v1082_v30  ;;  %v1215_v27 = vld [vmem:[#allocation5 + $0x268] sm:$0xf0]  ;;  %v1317_v28 = vld [vmem:[#allocation5 + $0x104] sm:$0xf]  ;;  %v978_v30 = vor.u32 %v1301_v19, %v975_v20  ;;  %v1154_v31 = vor.u32 %v1345_v22, %v1151_v23  ;;  %v1207_v37 = vld [vmem:[#allocation5 + $0x258] sm:$0xf0] }
  0x46   :  { %v1039_v29 = vld [vmem:[#allocation5 + $0x108] sm:$0xf0]  ;;  %v1218_v15 = vor.u32 %v1361_v24, %v1215_v27  ;;  %v1341_v40 = vld [vmem:[#allocation5 + $0x1c4] sm:$0xf]  ;;  %v1339_v46 = vld [vmem:[#allocation5 + $0x1b4] sm:$0xf] }
  0x47   :  { %651 = vmatpush.bf16.msrb.mxu0 %v1190_v33  ;;  %676 = vmatpush.bf16.msrb.mxu2 %v1010_v35  ;;  %v1343_v33 = vld [vmem:[#allocation5 + $0x1d4] sm:$0xf]  ;;  %v1042_v35 = vor.u32 %v1317_v28, %v1039_v29  ;;  %v1135_v41 = vld [vmem:[#allocation5 + $0x1c8] sm:$0xf0]  ;;  %v1357_v43 = vld [vmem:[#allocation5 + $0x244] sm:$0xf] }
  0x48   :  { %664 = vmatpush.bf16.msrb.mxu1 %v938_v36  ;;  %v1359_v36 = vld [vmem:[#allocation5 + $0x254] sm:$0xf]  ;;  %v1146_v38 = vor.u32 %v1343_v33, %v1143_v34  ;;  %v1199_v44 = vld [vmem:[#allocation5 + $0x248] sm:$0xf0]  ;;  %v1191_v49 = vld [vmem:[#allocation5 + $0x238] sm:$0xf0] }
  0x49   :  { %689 = vmatpush.bf16.msrb.mxu3 %v1074_v42  ;;  %v1210_v39 = vor.u32 %v1359_v36, %v1207_v37  ;;  %v1369_v42 = vld [vmem:[#allocation8 + $0x30] sm:$0xff]  ;;  %v1337_v52 = vld [vmem:[#allocation5 + $0x1a4] sm:$0xf]  ;;  %v1111_v57 = vld [vmem:[#allocation5 + $0x198] sm:$0xf0]  ;;  %s895_s19 = sshll.u32 %s1612_s5, 4  ;;  %s896_s19 = int_to_ptr.hbm [resolvable:$true] %s895_s19 }
  0x4a   :  { %v1119_v53 = vld [vmem:[#allocation5 + $0x1a8] sm:$0xf0]  ;;  %v1353_v54 = vld [vmem:[#allocation5 + $0x224] sm:$0xf]  ;;  %v1175_v59 = vld [vmem:[#allocation5 + $0x218] sm:$0xf0] }
  0x4b   :  { %652 = vmatpush.bf16.msrb.mxu0 %v1182_v45  ;;  %677 = vmatpush.bf16.msrb.mxu2 %v1002_v47  ;;  %v1138_v45 = vor.u32 %v1341_v40, %v1135_v41  ;;  %v1127_v47 = vld [vmem:[#allocation5 + $0x1b8] sm:$0xf0]  ;;  %v1103_v0 = vld [vmem:[#allocation5 + $0x188] sm:$0xf0]  ;;  %v1349_v1 = vld [vmem:[#allocation5 + $0x204] sm:$0xf] }
  0x4c   :  { %665 = vmatpush.bf16.msrb.mxu1 %v930_v48  ;;  %v1355_v48 = vld [vmem:[#allocation5 + $0x234] sm:$0xf]  ;;  %v1130_v50 = vor.u32 %v1339_v46, %v1127_v47  ;;  %v1167_v2 = vld [vmem:[#allocation5 + $0x208] sm:$0xf0]  ;;  %v1367_v7 = vld [vmem:[#allocation8 + $0x20] sm:$0xff] }
  0x4d   :  { %690 = vmatpush.bf16.msrb.mxu3 %v1066_v55  ;;  %v1194_v51 = vor.u32 %v1355_v48, %v1191_v49  ;;  %v1183_v55 = vld [vmem:[#allocation5 + $0x228] sm:$0xf0]  ;;  %v1170_v6 = vor.u32 %v1349_v1, %v1167_v2  ;;  %v1364_v10 = vld [vmem:[#allocation8 + $0x8] sm:$0xff]  ;;  %v1378_v14 = vld [vmem:[#allocation8 + $0x78] sm:$0xff] }
  0x4e   :  { %v1186_v56 = vor.u32 %v1353_v54, %v1183_v55  ;;  %v1365_v9 = vld [vmem:[#allocation8 + $0x10] sm:$0xff]  ;;  %v1376_v19 = vld [vmem:[#allocation8 + $0x68] sm:$0xff]  ;;  %v1374_v27 = vld [vmem:[#allocation8 + $0x58] sm:$0xff] }
  0x4f   :  { %653 = vmatpush.bf16.msrb.mxu0 %v1174_v58  ;;  %678 = vmatpush.bf16.msrb.mxu2 %v994_v62  ;;  %v1351_v58 = vld [vmem:[#allocation5 + $0x214] sm:$0xf]  ;;  %v1372_v33 = vld [vmem:[#allocation8 + $0x48] sm:$0xff]  ;;  %v1371_v37 = vld [vmem:[#allocation8 + $0x40] sm:$0xff] }
  0x50   :  { %666 = vmatpush.bf16.msrb.mxu1 %v922_v63  ;;  %v1178_v62 = vor.u32 %v1351_v58, %v1175_v59  ;;  %v1333_v63 = vld [vmem:[#allocation5 + $0x184] sm:$0xf] }
  0x51   :  { %691 = vmatpush.bf16.msrb.mxu3 %v1058_v8  ;;  %v1106_v4 = vor.u32 %v1333_v63, %v1103_v0  ;;  %v1366_v8 = vld [vmem:[#allocation8 + $0x18] sm:$0xff] }
  0x53   :  { %654 = vmatpush.bf16.msrb.mxu0 %v1166_v11  ;;  %679 = vmatpush.bf16.msrb.mxu2 %v986_v16  ;;  %v1363_v11 = vld [vmem:[#allocation8] sm:$0xff] }
  0x54   :  { %667 = vmatpush.bf16.msrb.mxu1 %v914_v17 }
  0x55   :  { %692 = vmatpush.bf16.msrb.mxu3 %v1050_v25  ;;  %v1375_v25 = vld [vmem:[#allocation8 + $0x60] sm:$0xff] }
  0x56   :  { %1219 = vmatmul.msk.bf16.vlgmr.msrb.gmra.mxu0 %vm582_vm1, %v1591_v26 }
  0x57   :  { %699 = vmatpush.bf16.msra.mxu0 %v1162_v18  ;;  %668 = vmatmul.bf16.vlgmr.msrb.gmra.mxu1 %v1577_v3  ;;  %v1202_v3 = vor.u32 %v1357_v43, %v1199_v44  ;;  %v181_v18 = vld [vmem:[#allocation7] sm:$0x3] }
  0x58   :  { %712 = vmatpush.bf16.msra.mxu1 %v593_v21  ;;  %680 = vmatpush.bf16.msrb.mxu2 %v978_v30  ;;  %v183_v20 = vperm.slane %v181_v18, 0  ;;  %v184_v44 = vperm.slane %v181_v18, 1 }
  0x59   :  { %693 = vmatpush.bf16.msrb.mxu3 %v1042_v35 }
  0x5b   :  { %700 = vmatpush.bf16.msra.mxu0 %v1154_v31  ;;  %681 = vmatmul.bf16.vlgmr.msrb.gmra.mxu2 %v1581_v12  ;;  %v1122_v12 = vor.u32 %v1337_v52, %v1119_v53  ;;  %v1373_v31 = vld [vmem:[#allocation8 + $0x50] sm:$0xff] }
  0x5c   :  { %861 = vmatpush.bf16.msra.mxu2 %v1370_v32  ;;  %713 = vmatpush.bf16.msra.mxu1 %v1218_v15 }
  0x5d   :  { %694 = vmatmul.bf16.vlgmr.msrb.gmra.mxu3 %v1579_v5  ;;  %v1335_v5 = vld [vmem:[#allocation5 + $0x194] sm:$0xf] }
  0x5e   :  { %v1114_v61 = vor.u32 %v1335_v5, %v1111_v57  ;;  %874 = vmatpush.bf16.msra.mxu3 %v1378_v14  ;;  %v1389_v57 = vld [vmem:[%s1611_s4] ss:$0 sm:$0xff] }
  0x5f   :  { %701 = vmatpush.bf16.msra.mxu0 %v1146_v38 }
  0x60   :  { %714 = vmatpush.bf16.msra.mxu1 %v1210_v39  ;;  %862 = vmatpush.bf16.msra.mxu2 %v1369_v42 }
  0x63   :  { %702 = vmatpush.bf16.msra.mxu0 %v1138_v45 }
  0x64   :  { %715 = vmatpush.bf16.msra.mxu1 %v1202_v3  ;;  %863 = vmatpush.bf16.msra.mxu2 %v1368_v60 }
  0x67   :  { %703 = vmatpush.bf16.msra.mxu0 %v1130_v50 }
  0x68   :  { %716 = vmatpush.bf16.msra.mxu1 %v1194_v51  ;;  %864 = vmatpush.bf16.msra.mxu2 %v1367_v7 }
  0x6b   :  { %704 = vmatpush.bf16.msra.mxu0 %v1122_v12 }
  0x6c   :  { %717 = vmatpush.bf16.msra.mxu1 %v1186_v56  ;;  %865 = vmatpush.bf16.msra.mxu2 %v1366_v8 }
  0x6f   :  { %705 = vmatpush.bf16.msra.mxu0 %v1114_v61 }
  0x70   :  { %718 = vmatpush.bf16.msra.mxu1 %v1178_v62  ;;  %866 = vmatpush.bf16.msra.mxu2 %v1365_v9 }
  0x73   :  { %706 = vmatpush.bf16.msra.mxu0 %v1106_v4 }
  0x74   :  { %719 = vmatpush.bf16.msra.mxu1 %v1170_v6  ;;  %867 = vmatpush.bf16.msra.mxu2 %v1364_v10 }
  0x76   :  { %707 = vmatmul.bf16.vlgmr.msra.gmra.mxu0 %v1583_v13  ;;  %v1377_v13 = vld [vmem:[#allocation8 + $0x70] sm:$0xff] }
  0x77   :  { %1220 = vmatmul.msk.bf16.vlgmr.msra.gmra.mxu1 %vm582_vm1, %v1591_v26  ;;  %875 = vmatpush.bf16.msra.mxu3 %v1377_v13 }
  0x78   :  { %868 = vmatpush.bf16.msra.mxu2 %v1363_v11 }
  0x7b   :  { %876 = vmatpush.bf16.msra.mxu3 %v1376_v19 }
  0x7f   :  { %877 = vmatpush.bf16.msra.mxu3 %v1375_v25 }
  0x83   :  { %878 = vmatpush.bf16.msra.mxu3 %v1374_v27 }
  0x87   :  { %879 = vmatpush.bf16.msra.mxu3 %v1373_v31 }
  0x8b   :  { %880 = vmatpush.bf16.msra.mxu3 %v1372_v33 }
  0x8f   :  { %881 = vmatpush.bf16.msra.mxu3 %v1371_v37 }
  0xb3   :  { %v604_v16 = vpop.f32.mrf.mxu0 }
  0xb4   :  { %v605_v26 = vadd.f32 %v604_v16, %v183_v20 }
  0xb6   :  { %v617_v17 = vpop.f32.mrf.mxu1 }
  0xb7   :  { %v618_v28 = vadd.f32 %v617_v17, %v605_v26 }
  0xbb   :  { %v606_v22 = vpop.f32.mrf.mxu0 }
  0xbd   :  { %v630_v21 = vpop.f32.mrf.mxu2 }
  0xbe   :  { %v619_v24 = vpop.f32.mrf.mxu1  ;;  %v631_v32 = vadd.f32 %v630_v21, %v618_v28 }
  0xbf   :  { %v643_v23 = vpop.f32.mrf.mxu3 }
  0xc0   :  { %v644_v15 = vadd.f32 %v643_v23, %v631_v32 }
  0xc5   :  { %v632_v29 = vpop.f32.mrf.mxu2 }
  0xc7   :  { %v645_v30 = vpop.f32.mrf.mxu3 }
  0xd3   :  { %v656_v34 = vpop.f32.mrf.mxu0 }
  0xd4   :  { %v657_v35 = vadd.f32 %v656_v34, %v644_v15  ;;  %v669_v36 = vpop.f32.mrf.mxu1 }
  0xd5   :  { %v670_v3 = vadd.f32 %v669_v36, %v184_v44 }
  0xd6   :  { %v725_v38 = vmax.f32 %v657_v35, 0.0 }
  0xd8   :  { %v727_v39 = vpack.c.bf16 %v725_v38, %v725_v38 }
  0xda   :  { %869 = vmatmul.bf16.vlgmr.msra.gmra.mxu2 %v727_v39 }
  0xdb   :  { %v658_v40 = vpop.f32.mrf.mxu0 }
  0xdc   :  { %v671_v41 = vpop.f32.mrf.mxu1 }
  0xde   :  { %v682_v42 = vpop.f32.mrf.mxu2 }
  0xdf   :  { %v683_v47 = vadd.f32 %v682_v42, %v670_v3 }
  0xe0   :  { %v695_v43 = vpop.f32.mrf.mxu3 }
  0xe1   :  { %v696_v48 = vadd.f32 %v695_v43, %v683_v47 }
  0xe6   :  { %v684_v45 = vpop.f32.mrf.mxu2 }
  0xe8   :  { %v697_v46 = vpop.f32.mrf.mxu3 }
  0xf3   :  { %v708_v49 = vpop.f32.mrf.mxu0 }
  0xf4   :  { %v709_v50 = vadd.f32 %v708_v49, %v696_v48  ;;  %v721_v51 = vpop.f32.mrf.mxu1 }
  0xf6   :  { %v722_v52 = vadd.f32 %v721_v51, %v709_v50 }
  0xf8   :  { %v726_v53 = vmax.f32 %v722_v52, 0.0 }
  0xfa   :  { %v728_v54 = vpack.c.bf16 %v726_v53, %v726_v53 }
  0xfb   :  { %v710_v55 = vpop.f32.mrf.mxu0 }
  0xfc   :  { %v723_v12 = vpop.f32.mrf.mxu1  ;;  %882 = vmatmul.bf16.vlgmr.msra.gmra.mxu3 %v728_v54 }
 0x15d   :  { %v870_v56 = vpop.f32.mrf.mxu2 }
 0x15e   :  { %v871_v58 = vadd.f32 %v1389_v57, %v870_v56 }
 0x165   :  { %v872_v5 = vpop.f32.mrf.mxu2 }
 0x17f   :  { %v883_v59 = vpop.f32.mrf.mxu3 }
 0x180   :  { %v884_v61 = vadd.f32 %v883_v59, %v871_v58 }
 0x182   :  { %887 = vst [vmem:[#allocation10] sm:$0x3] %v884_v61 }
 0x183   :  { %898 = dma.vmem_to_hbm [thread:$0]  %s894_s16, 32, %s896_s19, [#allocation4]  }
 0x187   :  { %v885_v62 = vpop.f32.mrf.mxu3 }
 0x188   :  { %1516 = dma.done.wait [#allocation4], 32  }
 0x189   :  { %1517 = vsyncadd [#allocation4], 4294967264 }
 0x18a   :  { %903 = vsyncpa [#allocation3], 1 }
 0x18b   :  { %904 = vsyncpa [#allocation6], 1 }
 0x18c   :  { %905 = vsyncpa [#allocation9], 1 }
 0x18d   :  { %906 = vsyncpa [#allocation4], 1 }

</bundles_post_ra>
